<compile_context>
chip_gen: v7x
topology: tpu7x:2x2x1
jax: 0.10.0
libtpu: 0.0.40
codegen_flags: <defaults>
</compile_context>

<pallas_src>
import jax
import jax.numpy as jnp
from jax.experimental import pallas as pl
from jax.experimental.pallas import tpu as pltpu


def _embedding_gather_kernel(idx_ref, table_ref, out_ref):
    """Gather T rows of the VMEM-resident table via a one-hot MXU matmul.

    idx_ref:   (T, 1) int32  -- token indices for this tile
    table_ref: (V, H)        -- full soft-prompt table, resident in VMEM
    out_ref:   (T, H)        -- gathered embeddings
    """
    idx = idx_ref[...]                                             # (T, 1)
    T = idx.shape[0]
    V = table_ref.shape[0]
    col = jax.lax.broadcasted_iota(jnp.int32, (T, V), 1)           # (T, V)
    onehot = (col == idx).astype(table_ref.dtype)                  # exact 0/1 mask
    out_ref[...] = jnp.dot(
        onehot, table_ref[...], preferred_element_type=jnp.float32
    ).astype(out_ref.dtype)


def merge_embedding_forward(indices, embedding_table):
    """Pallas equivalent of MergeEmbedding.forward: embedding lookup."""
    B, S = indices.shape
    V, H = embedding_table.shape
    flat_idx = indices.reshape(-1).astype(jnp.int32)
    N = flat_idx.shape[0]

    # Sublane alignment: 8 rows for 32-bit outputs, 16 for packed (bf16/fp8) dtypes.
    row_align = 8 if jnp.dtype(embedding_table.dtype).itemsize >= 4 else 16
    # Tokens per grid step: cap at 128 rows, round up to sublane alignment.
    T = min(N, 128)
    T = ((T + row_align - 1) // row_align) * row_align
    N_pad = pl.cdiv(N, T) * T

    # Pad indices (padding rows gather row 0; they are sliced off below).
    idx_pad = jnp.zeros((N_pad, 1), jnp.int32).at[:N, 0].set(flat_idx)

    grid = (N_pad // T,)   # collapses to a single step for this problem size

    out = pl.pallas_call(
        _embedding_gather_kernel,
        out_shape=jax.ShapeDtypeStruct((N_pad, H), embedding_table.dtype),
        grid_spec=pl.GridSpec(
            grid=grid,
            in_specs=[
                # (T, 1) tile of indices for this step (last dim == full extent).
                pl.BlockSpec((T, 1), lambda i: (i, 0)),
                # Whole table resident in VMEM for every step (fetched once).
                # TODO(synk): for very large V*H that exceed VMEM, fall back to a
                # pipelined data-dependent row gather with pl.Buffered(3+).
                pl.BlockSpec((V, H), lambda i: (0, 0)),
            ],
            out_specs=pl.BlockSpec((T, H), lambda i: (i, 0)),
        ),
        compiler_params=pltpu.CompilerParams(
            dimension_semantics=("parallel",)),   # independent token batches
    )(idx_pad, embedding_table)

    return out[:N].reshape(B, S, H)


if __name__ == "__main__":
    key = jax.random.PRNGKey(0)
    k_emb, k_idx = jax.random.split(key)

    # Small shapes implied by the module: a soft-prompt embedding table and
    # integer prompt indices of shape (batch, prompt_len).
    B, S = 2, 8          # batch, prompt length
    V, H = 16, 128       # number of soft-prompt tokens, hidden size (lane-dense)

    # Deterministic "soft_prompt" parameter (equivalent of nn.Embedding weight).
    soft_prompt_table = jax.random.normal(k_emb, (V, H), dtype=jnp.float32)
    indices = jax.random.randint(k_idx, (B, S), 0, V, dtype=jnp.int32)

    out = merge_embedding_forward(indices, soft_prompt_table)
    out = jax.block_until_ready(out)

    # Correctness check against plain-JAX gather (nn.Embedding semantics).
    ref = soft_prompt_table[indices]
    assert out.shape == (B, S, H), out.shape
    assert out.dtype == soft_prompt_table.dtype
    assert jnp.allclose(out, ref), "mismatch vs reference gather"

    print("KERNEL_OK")
</pallas_src>

<mosaic_0001>
module attributes {stable_mosaic.version = 11 : i64} {
  func.func @_embedding_gather_kernel(%arg0: i32, %arg1: memref<16x1xi32, #tpu.memory_space<vmem>>, %arg2: memref<16x128xf32, #tpu.memory_space<vmem>>, %arg3: memref<16x128xf32, #tpu.memory_space<vmem>>) attributes {dimension_semantics = [#tpu.dimension_semantics<parallel>], iteration_bounds = array<i64: 1>, scalar_prefetch = 0 : i64, scratch_operands = 0 : i64, tpu.core_type = #tpu.core_type<tc>, window_params = [{transform_indices = @transform_0, window_bounds = array<i64: 16, 1>}, {pipeline_mode = #tpu.pipeline_mode<synchronous>, transform_indices = @transform_1, window_bounds = array<i64: 16, 128>}, {transform_indices = @transform_2, window_bounds = array<i64: 16, 128>}]} {
    %c0 = arith.constant 0 : index
    %c0_0 = arith.constant 0 : index
    %0 = vector.load %arg1[%c0, %c0_0] : memref<16x1xi32, #tpu.memory_space<vmem>>, vector<16x1xi32>
    %1 = tpu.iota {dimensions = array<i32: 1>} : vector<16x16xi32>
    %2 = vector.broadcast %0 : vector<16x1xi32> to vector<16x16xi32>
    %3 = arith.cmpi eq, %1, %2 : vector<16x16xi32>
    %4 = arith.extui %3 : vector<16x16xi1> to vector<16x16xi32>
    %5 = arith.sitofp %4 : vector<16x16xi32> to vector<16x16xf32>
    %c0_1 = arith.constant 0 : index
    %c0_2 = arith.constant 0 : index
    %6 = vector.load %arg2[%c0_1, %c0_2] : memref<16x128xf32, #tpu.memory_space<vmem>>, vector<16x128xf32>
    %cst = arith.constant dense<0.000000e+00> : vector<16x128xf32>
    %7 = tpu.matmul %5, %6, %cst {dimension_numbers = #tpu.dot_dimension_numbers<[1], [0], [0], [1], [0, 0, 1, 1], [], []>} : vector<16x16xf32>, vector<16x128xf32>, vector<16x128xf32> -> vector<16x128xf32>
    %c0_3 = arith.constant 0 : index
    %c0_4 = arith.constant 0 : index
    %8 = vector.load %arg3[%c0_3, %c0_4] : memref<16x128xf32, #tpu.memory_space<vmem>>, vector<16x128xf32>
    tpu.vector_store %arg3[%c0_3, %c0_4], %7 {strides = array<i32>} : memref<16x128xf32, #tpu.memory_space<vmem>>, vector<16x128xf32>,
    return
  }
  func.func @transform_0(%arg0: i32) -> (i32, i32) {
    %c0_i32 = arith.constant 0 : i32
    %c0_i32_0 = arith.constant 0 : i32
    return %arg0, %c0_i32 : i32, i32
  }
  func.func @transform_1(%arg0: i32) -> (i32, i32) {
    %c0_i32 = arith.constant 0 : i32
    %c0_i32_0 = arith.constant 0 : i32
    %c0_i32_1 = arith.constant 0 : i32
    return %c0_i32, %c0_i32_0 : i32, i32
  }
  func.func @transform_2(%arg0: i32) -> (i32, i32) {
    %c0_i32 = arith.constant 0 : i32
    %c0_i32_0 = arith.constant 0 : i32
    return %arg0, %c0_i32 : i32, i32
  }
}

</mosaic_0001>

<bundles_post_ra>
// kernel: tpu_custom_call.1
= control target key start
LH: loop header
LB: loop body
LE: loop exit
PB: predicated region body
PF: predicated region fallthrough
CT: control target
= control target key end

     0   :  { %s223_s0 = inlined_call_operand.vmem [shape: s32[16,1], index: 0, kind: input, shape index: {}]   ;;  %s224_s1 = inlined_call_operand.vmem [shape: f32[16,128], index: 1, kind: input, shape index: {}]   ;;  %s225_s2 = inlined_call_operand.hbm [shape: f32[16,128], index: 2, kind: output, shape index: {}]  }
   0x1   :  { %v12_v0 = vld [vmem:[%s223_s0] sm:$0xff] }
   0x2   :  { %7 = vsyncpa [#allocation3], 0  ;;  %v179_v1 = vmov 0   ;;  %v28_v2 = vld [vmem:[%s224_s1] sm:$0xff]  ;;  %v29_v3 = vld [vmem:[%s224_s1 + $0x8] sm:$0xff]  ;;  %v14_v6 = vlaneseq  ;;  %vm30_vm0 = vcmask 130048  }
   0x3   :  { %154 = vset.pattern.permute.xlu0 %v179_v1  ;;  %v145_v4 = vpack.c.bf16 %v29_v3, %v28_v2  ;;  %v13_v5 = vld [vmem:[%s223_s0 + $0x8] sm:$0xff]  ;;  %v180_v9 = vmov 0.0   ;;  %s181_s1 = smov [#allocation2]  }
   0x4   :  { %17 = vperm.xlu0 %154, %v12_v0   ;;  %v15_v7 = vand.u32 127, %v14_v6  ;;  %s119_s17 = sshll.u32 %s181_s1, 4  ;;  %s120_s17 = int_to_ptr.vmem [resolvable:$true] %s119_s17 }
   0x5   :  { %146 = vmatprep.subr.bf16.mxu0 %v145_v4  ;;  %s155_s0 = scalar_lea.vmem %s120_s17, 256  ;;  %p160_p1 = scmp.lt.s32.totalorder %s120_s17, %s120_s17 }
   0x6   :  { %148 = vmatpush3.bf16.msra.mxu0 %v145_v4  ;;  %p156_p0 = scmp.ne.s32.totalorder %s120_s17, %s155_s0  ;;  %p161_p2 = scmp.lt.s32.totalorder %s155_s0, %s155_s0 }
   0x8   :  { %20 = vperm.xlu0 %154, %v13_v5   ;;  %p162_p3 = por %p161_p2, %p160_p1 }
   0xa   :  { %p163_p4 = pnand %p162_p3, %p156_p0 }
  0x83   :  { %v18_v8 = vpop.permute.xlu0 %17 }
  0x84   :  { %vm22_vm1 = vcmp.eq.s32.totalorder %v15_v7, %v18_v8 }
  0x85   :  { %v130_v10 = vsel %vm22_vm1, 1.0, %v180_v9 }
  0x86   :  { %142 = vmatprep.mubr.msk.f32.mxu0 %vm30_vm0, %v130_v10 }
  0x87   :  { %v21_v11 = vpop.permute.xlu0 %20 }
  0x88   :  { %vm23_vm2 = vcmp.eq.s32.totalorder %v15_v7, %v21_v11 }
  0x89   :  { %v131_v12 = vsel %vm23_vm2, 1.0, %v180_v9 }
  0x8a   :  { %143 = vmatmul.mubr.msk.f32.vlgmr.msra.gmra.mrb[0].mxu0 %vm30_vm0, %v131_v12 }
 0x15d   :  { %v144_v13 = vpop.f32.mrb[0].mxu0 }
 0x15e   :  { %113 = vst [vmem:[#allocation2 + $0x8] sm:$0xff] %v144_v13  ;;  %v103_v14 = vpop.f32.mrb[1].mxu0 }
 0x15f   :  { %112 = vst [vmem:[#allocation2] sm:$0xff] %v103_v14 }
 0x160   :  { %166 = shalt.err (!%p163_p4)
}
 0x161   :  { %s167_s20 = scalar_lea.hbm %s225_s2, 256 }
 0x162   :  { %p168_p5 = scmp.ne.s32.totalorder %s225_s2, %s167_s20  ;;  %p171_p6 = scmp.lt.u32.totalorder %s167_s20, %s225_s2 }
 0x164   :  { %p173_p7 = pnand %p171_p6, %p168_p5 }
 0x166   :  { %176 = shalt.err (!%p173_p7)
}
 0x167   :  { %s182_s25 = smov 128   ;;  %s183_s26 = smov 8  }
 0x168   :  { %125 = dma.vmem_to_hbm [thread:$0]  %s120_s17, 256, %s225_s2, [#allocation3], %s182_s25, %s182_s25, %s183_s26  }
 0x169   :  { %177 = dma.done.wait [#allocation3], 256  }
 0x16a   :  { %178 = vsyncadd [#allocation3], 4294967040 }
 0x16b   :  { %129 = vsyncpa [#allocation3], 1 }

</bundles_post_ra>
